<compile_context>
chip_gen: v6e
topology: v6e:2x2x1
jax: 0.10.0
libtpu: 0.0.40
codegen_flags: <defaults>
</compile_context>

<pallas_src>
import jax
import jax.numpy as jnp
from jax.experimental import pallas as pl
from jax.experimental.pallas import tpu as pltpu

BN_EPS = 1e-5
LANES = 128
TM = 128                      # GCN output-row tile
TK = 128                      # GCN reduction (column-of-A) tile
VMEM_LIMIT = 32 * 1024 * 1024
MXU_BF16 = True               # feed A_norm / H to the MXU as bf16 (f32 accumulate)


def _round_up(x, m):
    return (x + m - 1) // m * m


def _full_spec(shape):
    # Single-block (whole array resident in VMEM); grid is empty.
    return pl.BlockSpec(shape, lambda: (0,) * len(shape))


# ---------------------------------------------------------------------------
# Kernel 1: Edgeconvf + bn_e + relu + linw + relu   (per-edge hot path)
#   Single lane-dense output slab (E, EOP):
#     [:, :edge_out] = bn_e(lin2(...)) relu'd  +  edge_attr   (edge residual)
#     [:, edge_out]  = relu(linw(edge_features))              (edge weight)
# ---------------------------------------------------------------------------
def edge_kernel(xsum_ref, ec_ref, ea_ref,
                w1_ref, b1_ref, w2n_ref, w2ef_ref, b2_ref, ww_ref, bw_ref,
                out_ref):
    # Edgeconvf: x_em = relu(lin1(x_j) + lin1(x_i)) == relu((x_j + x_i) @ W1 + 2 b1)
    x_em = jnp.maximum(
        jnp.dot(xsum_ref[...], w1_ref[...], preferred_element_type=jnp.float32)
        + b1_ref[...], 0.0)

    # lin2(concat(x_em, edge_attr, edge_f)): x_em block + pre-concatenated [ea|ef] block.
    raw = (jnp.dot(x_em, w2n_ref[...], preferred_element_type=jnp.float32)
           + jnp.dot(ec_ref[...], w2ef_ref[...], preferred_element_type=jnp.float32)
           + b2_ref[...])

    # bn_e (training-mode batch stats over E, biased var) + relu.  Padded columns
    # of raw are exactly 0 (zero-padded weights/bias) and stay 0 through BN/relu.
    mean = jnp.mean(raw, axis=0, keepdims=True)
    var = jnp.mean((raw - mean) ** 2, axis=0, keepdims=True)
    feat = jnp.maximum((raw - mean) * jax.lax.rsqrt(var + BN_EPS), 0.0)

    # edge_weight = relu(linw(feat)); ww/bw are zero-padded so the result lands in
    # slab column `edge_out` only, every other column of wgt_slab is relu(0) = 0.
    wgt_slab = jnp.maximum(
        jnp.dot(feat, ww_ref[...], preferred_element_type=jnp.float32) + bw_ref[...],
        0.0)

    # One unmasked, lane-dense store.
    out_ref[...] = feat + ea_ref[...] + wgt_slab


# ---------------------------------------------------------------------------
# Kernel 2: GCNConv aggregation, tiled:  agg = A_norm @ (X @ Wg) + bg
#   grid = (row tiles I [parallel], K tiles [arbitrary]); agg block is the
#   accumulator (resident across K).  Also emits per-row-tile BN partial stats
#   (sum / sumsq over real rows) so bn_n can stay globally correct under tiling.
# ---------------------------------------------------------------------------
def gcn_agg_kernel(x_ref, a_ref, wg_ref, bg_ref, mask_ref,
                   agg_ref, psum_ref, psumsq_ref):
    k = pl.program_id(1)

    @pl.when(k == 0)
    def _init():
        agg_ref[...] = jnp.zeros_like(agg_ref)

    # H tile = X[k_tile] @ Wg (tiny K=node_in), then the big A @ H push on the MXU.
    h = jnp.dot(x_ref[...], wg_ref[...], preferred_element_type=jnp.float32)
    agg_ref[...] += jnp.dot(a_ref[...], h.astype(a_ref.dtype),
                            preferred_element_type=jnp.float32)

    @pl.when(k == pl.num_programs(1) - 1)
    def _finalize():
        # add bias, zero the padded rows, emit per-row-tile BN partial statistics.
        agg = (agg_ref[...] + bg_ref[...]) * mask_ref[...]
        agg_ref[...] = agg
        psum_ref[...] = jnp.sum(agg, axis=0, keepdims=True)
        psumsq_ref[...] = jnp.sum(agg * agg, axis=0, keepdims=True)


# ---------------------------------------------------------------------------
# Forward wrapper (glue: gathers / scatter-built adjacency stay in plain JAX)
# ---------------------------------------------------------------------------
def res_egblk_0_forward(params, x, edge_index, edge_f, edge_attr):
    f32 = jnp.float32
    N, node_in = x.shape
    E = edge_index.shape[1]
    edge_in = edge_attr.shape[1]
    Ef = edge_f.shape[1]
    edge_out = params["b2"].shape[1]
    node_out = params["bg"].shape[1]
    # use_nodelin=False / use_edgelin=False -> residuals require matching dims
    assert node_out == node_in and edge_out == edge_in

    EOP = _round_up(edge_out + 1, LANES)   # padded edge width (+1 col for edge_weight)
    NOP = _round_up(node_out, LANES)       # padded node width
    N_pad = _round_up(N, max(TM, TK))
    num_i = N_pad // TM
    num_k = N_pad // TK

    # ---- parameter packing: fold constants, fuse, zero-pad to lane-dense widths ----
    b1_2x = 2.0 * params["b1"]
    w2n_p = jnp.zeros((node_in, EOP), f32).at[:, :edge_out].set(params["w2n"])
    w2ef = jnp.concatenate([params["w2e"], params["w2f"]], axis=0)
    w2ef_p = jnp.zeros((edge_in + Ef, EOP), f32).at[:, :edge_out].set(w2ef)
    b2_p = jnp.zeros((1, EOP), f32).at[:, :edge_out].set(params["b2"])
    ww_p = jnp.zeros((EOP, EOP), f32).at[:edge_out, edge_out].set(params["ww"][:, 0])
    bw_p = jnp.zeros((1, EOP), f32).at[0, edge_out].set(params["bw"][0, 0])
    wg_p = jnp.zeros((node_in, NOP), f32).at[:, :node_out].set(params["wg"])
    bg_p = jnp.zeros((1, NOP), f32).at[:, :node_out].set(params["bg"])

    # ---- per-edge inputs (data-dependent gather stays in XLA glue) ----
    src = edge_index[0]
    dst = edge_index[1]
    x_sum = x[src] + x[dst]                                   # pre-summed gather
    ec = jnp.concatenate([edge_attr, edge_f], axis=1)         # (E, edge_in + Ef)
    ea_p = jnp.zeros((E, EOP), f32).at[:, :edge_in].set(edge_attr)

    # TODO(synk): for E beyond a few thousand, tile the edge kernel over E and switch
    # bn_e to the same two-pass (sum/sumsq) scheme used below for bn_n.
    slab = pl.pallas_call(
        edge_kernel,
        out_shape=jax.ShapeDtypeStruct((E, EOP), f32),
        in_specs=[_full_spec(x_sum.shape), _full_spec(ec.shape), _full_spec(ea_p.shape),
                  _full_spec(params["w1"].shape), _full_spec(b1_2x.shape),
                  _full_spec(w2n_p.shape), _full_spec(w2ef_p.shape),
                  _full_spec(b2_p.shape), _full_spec(ww_p.shape), _full_spec(bw_p.shape)],
        out_specs=_full_spec((E, EOP)),
        compiler_params=pltpu.CompilerParams(vmem_limit_bytes=VMEM_LIMIT),
    )(x_sum, ec, ea_p, params["w1"], b1_2x, w2n_p, w2ef_p, b2_p, ww_p, bw_p)

    edge_attr_out = slab[:, :edge_out]     # edge_features + edge_attr (residual)
    w = slab[:, edge_out]                  # relu(linw(edge_features)), per edge

    # --- gcn_norm glue (PyG GCNConv, add_self_loops=True, symmetric norm) ---
    # TODO(synk): the scatter-add building the dense normalized adjacency is
    # data-dependent and stays in XLA; a sparse/CSR Pallas formulation is out of scope.
    loop_idx = jnp.arange(N, dtype=src.dtype)
    src_full = jnp.concatenate([src, loop_idx])
    dst_full = jnp.concatenate([dst, loop_idx])
    w_full = jnp.concatenate([w, jnp.ones((N,), f32)])
    deg = jnp.zeros((N,), f32).at[dst_full].add(w_full)
    dinv = jnp.where(deg > 0.0, jax.lax.rsqrt(deg), 0.0)
    norm = dinv[src_full] * w_full * dinv[dst_full]
    a_norm = jnp.zeros((N_pad, N_pad), f32).at[dst_full, src_full].add(norm)
    a_norm = a_norm.astype(jnp.bfloat16 if MXU_BF16 else f32)   # MXU input stream

    x_k = jnp.zeros((N_pad, node_in), f32).at[:N].set(x)        # rows padded for K tiles
    row_mask = (jnp.arange(N_pad) < N).astype(f32)[:, None]     # (N_pad, 1)

    agg, psum, psumsq = pl.pallas_call(
        gcn_agg_kernel,
        out_shape=(jax.ShapeDtypeStruct((N_pad, NOP), f32),
                   jax.ShapeDtypeStruct((num_i, NOP), f32),
                   jax.ShapeDtypeStruct((num_i, NOP), f32)),
        grid=(num_i, num_k),
        in_specs=[pl.BlockSpec((TK, node_in), lambda i, k: (k, 0)),
                  pl.BlockSpec((TM, TK), lambda i, k: (i, k)),
                  pl.BlockSpec((node_in, NOP), lambda i, k: (0, 0)),
                  pl.BlockSpec((1, NOP), lambda i, k: (0, 0)),
                  pl.BlockSpec((TM, 1), lambda i, k: (i, 0))],
        out_specs=(pl.BlockSpec((TM, NOP), lambda i, k: (i, 0)),
                   pl.BlockSpec((1, NOP), lambda i, k: (i, 0)),
                   pl.BlockSpec((1, NOP), lambda i, k: (i, 0))),
        compiler_params=pltpu.CompilerParams(
            dimension_semantics=("parallel", "arbitrary"),
            vmem_limit_bytes=VMEM_LIMIT),
    )(x_k, a_norm, wg_p, bg_p, row_mask)

    # ---- bn_n (global batch stats from the per-tile partials) + relu + residual ----
    x_res = jnp.zeros((N_pad, NOP), f32).at[:N, :node_in].set(x)
    inv_n = 1.0 / float(N)

    def bn_node_kernel(agg_ref, ps_ref, psq_ref, xres_ref, xout_ref):
        mean = jnp.sum(ps_ref[...], axis=0, keepdims=True) * inv_n
        ex2 = jnp.sum(psq_ref[...], axis=0, keepdims=True) * inv_n
        var = jnp.maximum(ex2 - mean * mean, 0.0)
        x1 = jnp.maximum((agg_ref[...] - mean) * jax.lax.rsqrt(var + BN_EPS), 0.0)
        xout_ref[...] = x1 + xres_ref[...]

    x_out_pad = pl.pallas_call(
        bn_node_kernel,
        out_shape=jax.ShapeDtypeStruct((N_pad, NOP), f32),
        grid=(num_i,),
        in_specs=[pl.BlockSpec((TM, NOP), lambda i: (i, 0)),
                  pl.BlockSpec((num_i, NOP), lambda i: (0, 0)),
                  pl.BlockSpec((num_i, NOP), lambda i: (0, 0)),
                  pl.BlockSpec((TM, NOP), lambda i: (i, 0))],
        out_specs=pl.BlockSpec((TM, NOP), lambda i: (i, 0)),
        compiler_params=pltpu.CompilerParams(
            dimension_semantics=("parallel",),
            vmem_limit_bytes=VMEM_LIMIT),
    )(agg, psum, psumsq, x_res)

    x_out = x_out_pad[:N, :node_out]
    return x_out, edge_index, edge_f, edge_attr_out


# ---------------------------------------------------------------------------
# Deterministic parameter construction (logical shapes from Res_EGblk_0.__init__)
# ---------------------------------------------------------------------------
def make_params(key, node_in, node_out, edge_in, edge_out, Ef):
    ks = jax.random.split(key, 8)
    s = 0.1
    return {
        # Edgeconvf.lin1: Linear(node_in -> node_in)   (N_hiddens = node_in)
        "w1": s * jax.random.normal(ks[0], (node_in, node_in), jnp.float32),
        "b1": s * jax.random.normal(ks[1], (1, node_in), jnp.float32),
        # Edgeconvf.lin2: Linear(node_in + edge_in + Ef -> edge_out), split by input
        "w2n": s * jax.random.normal(ks[2], (node_in, edge_out), jnp.float32),
        "w2e": s * jax.random.normal(ks[3], (edge_in, edge_out), jnp.float32),
        "w2f": s * jax.random.normal(ks[4], (Ef, edge_out), jnp.float32),
        "b2": s * jax.random.normal(ks[5], (1, edge_out), jnp.float32),
        # linw: Linear(edge_out -> 1)
        "ww": s * jax.random.normal(ks[6], (edge_out, 1), jnp.float32),
        "bw": jnp.zeros((1, 1), jnp.float32),
        # GCNConv.lin: Linear(node_in -> node_out, bias separate)
        "wg": s * jax.random.normal(ks[7], (node_in, node_out), jnp.float32),
        "bg": jnp.zeros((1, node_out), jnp.float32),
    }


if __name__ == "__main__":
    key = jax.random.PRNGKey(0)
    k_x, k_src, k_off, k_ef, k_ea, k_p = jax.random.split(key, 6)

    N, E = 16, 24
    node_in = node_out = 8       # residual x_1 + x requires node_out == node_in
    edge_in = edge_out = 8       # residual edge_features + edge_attr requires equality
    Ef = 4

    x = jax.random.normal(k_x, (N, node_in), jnp.float32)
    src = jax.random.randint(k_src, (E,), 0, N, dtype=jnp.int32)
    off = jax.random.randint(k_off, (E,), 1, N, dtype=jnp.int32)
    dst = (src + off) % N        # no self-loops, so GCN self-loop handling is unambiguous
    edge_index = jnp.stack([src, dst], axis=0)
    edge_f = jax.random.normal(k_ef, (E, Ef), jnp.float32)
    edge_attr = jax.random.normal(k_ea, (E, edge_in), jnp.float32)

    params = make_params(k_p, node_in, node_out, edge_in, edge_out, Ef)

    fwd = jax.jit(res_egblk_0_forward)
    x_out, ei_out, ef_out, ea_out = fwd(params, x, edge_index, edge_f, edge_attr)
    jax.block_until_ready((x_out, ea_out))

    assert x_out.shape == (N, node_out)
    assert ea_out.shape == (E, edge_out)
    print("KERNEL_OK")
</pallas_src>

<mosaic_0001>
module attributes {stable_mosaic.version = 11 : i64} {
  func.func private @main(%arg0: i32) attributes {dimension_semantics = [#tpu.dimension_semantics<core_parallel>], iteration_bounds = array<i64: 2>, tpu.core_type = #tpu.core_type<sc_scalar_subcore>, window_params = []} {
    return
  }
}

module attributes {stable_mosaic.version = 11 : i64} {
  func.func private @main(%arg0: i32) attributes {dimension_semantics = [#tpu.dimension_semantics<core_parallel>], iteration_bounds = array<i64: 2>, tpu.core_type = #tpu.core_type<sc_scalar_subcore>, window_params = []} {
    return
  }
}

module attributes {stable_mosaic.version = 11 : i64} {
  func.func @edge_kernel(%arg0: memref<24x8xf32, #tpu.memory_space<vmem>>, %arg1: memref<24x12xf32, #tpu.memory_space<vmem>>, %arg2: memref<24x128xf32, #tpu.memory_space<vmem>>, %arg3: memref<8x8xf32, #tpu.memory_space<vmem>>, %arg4: memref<1x8xf32, #tpu.memory_space<vmem>>, %arg5: memref<8x128xf32, #tpu.memory_space<vmem>>, %arg6: memref<12x128xf32, #tpu.memory_space<vmem>>, %arg7: memref<1x128xf32, #tpu.memory_space<vmem>>, %arg8: memref<128x128xf32, #tpu.memory_space<vmem>>, %arg9: memref<1x128xf32, #tpu.memory_space<vmem>>, %arg10: memref<24x128xf32, #tpu.memory_space<vmem>>) attributes {dimension_semantics = [], scalar_prefetch = 0 : i64, scratch_operands = 0 : i64, tpu.core_type = #tpu.core_type<tc>} {
    %c0 = arith.constant 0 : index
    %c0_0 = arith.constant 0 : index
    %0 = vector.load %arg0[%c0, %c0_0] : memref<24x8xf32, #tpu.memory_space<vmem>>, vector<24x8xf32>
    %c0_1 = arith.constant 0 : index
    %c0_2 = arith.constant 0 : index
    %1 = vector.load %arg3[%c0_1, %c0_2] : memref<8x8xf32, #tpu.memory_space<vmem>>, vector<8x8xf32>
    %cst = arith.constant dense<0.000000e+00> : vector<24x8xf32>
    %2 = tpu.matmul %0, %1, %cst {dimension_numbers = #tpu.dot_dimension_numbers<[1], [0], [0], [1], [0, 0, 1, 1], [], []>} : vector<24x8xf32>, vector<8x8xf32>, vector<24x8xf32> -> vector<24x8xf32>
    %c0_3 = arith.constant 0 : index
    %c0_4 = arith.constant 0 : index
    %3 = vector.load %arg4[%c0_3, %c0_4] : memref<1x8xf32, #tpu.memory_space<vmem>>, vector<1x8xf32>
    %4 = vector.broadcast %3 : vector<1x8xf32> to vector<24x8xf32>
    %5 = arith.addf %2, %4 : vector<24x8xf32>
    %cst_5 = arith.constant 0.000000e+00 : f32
    %6 = vector.broadcast %cst_5 : f32 to vector<24x8xf32>
    %7 = arith.maximumf %5, %6 : vector<24x8xf32>
    %c0_6 = arith.constant 0 : index
    %c0_7 = arith.constant 0 : index
    %8 = vector.load %arg5[%c0_6, %c0_7] : memref<8x128xf32, #tpu.memory_space<vmem>>, vector<8x128xf32>
    %cst_8 = arith.constant dense<0.000000e+00> : vector<24x128xf32>
    %9 = tpu.matmul %7, %8, %cst_8 {dimension_numbers = #tpu.dot_dimension_numbers<[1], [0], [0], [1], [0, 0, 1, 1], [], []>} : vector<24x8xf32>, vector<8x128xf32>, vector<24x128xf32> -> vector<24x128xf32>
    %c0_9 = arith.constant 0 : index
    %c0_10 = arith.constant 0 : index
    %10 = vector.load %arg1[%c0_9, %c0_10] : memref<24x12xf32, #tpu.memory_space<vmem>>, vector<24x12xf32>
    %c0_11 = arith.constant 0 : index
    %c0_12 = arith.constant 0 : index
    %11 = vector.load %arg6[%c0_11, %c0_12] : memref<12x128xf32, #tpu.memory_space<vmem>>, vector<12x128xf32>
    %cst_13 = arith.constant dense<0.000000e+00> : vector<24x128xf32>
    %12 = tpu.matmul %10, %11, %cst_13 {dimension_numbers = #tpu.dot_dimension_numbers<[1], [0], [0], [1], [0, 0, 1, 1], [], []>} : vector<24x12xf32>, vector<12x128xf32>, vector<24x128xf32> -> vector<24x128xf32>
    %13 = arith.addf %9, %12 : vector<24x128xf32>
    %c0_14 = arith.constant 0 : index
    %c0_15 = arith.constant 0 : index
    %14 = vector.load %arg7[%c0_14, %c0_15] : memref<1x128xf32, #tpu.memory_space<vmem>>, vector<1x128xf32>
    %15 = vector.broadcast %14 : vector<1x128xf32> to vector<24x128xf32>
    %16 = arith.addf %13, %15 : vector<24x128xf32>
    %cst_16 = arith.constant dense<0.000000e+00> : vector<128xf32>
    %17 = vector.multi_reduction <add>, %16, %cst_16 [0] : vector<24x128xf32> to vector<128xf32>
    %18 = vector.shape_cast %17 : vector<128xf32> to vector<1x128xf32>
    %cst_17 = arith.constant 2.400000e+01 : f32
    %19 = vector.broadcast %cst_17 : f32 to vector<1x128xf32>
    %20 = arith.divf %18, %19 : vector<1x128xf32>
    %21 = vector.broadcast %20 : vector<1x128xf32> to vector<24x128xf32>
    %22 = arith.subf %16, %21 : vector<24x128xf32>
    %23 = arith.mulf %22, %22 : vector<24x128xf32>
    %cst_18 = arith.constant dense<0.000000e+00> : vector<128xf32>
    %24 = vector.multi_reduction <add>, %23, %cst_18 [0] : vector<24x128xf32> to vector<128xf32>
    %25 = vector.shape_cast %24 : vector<128xf32> to vector<1x128xf32>
    %cst_19 = arith.constant 2.400000e+01 : f32
    %26 = vector.broadcast %cst_19 : f32 to vector<1x128xf32>
    %27 = arith.divf %25, %26 : vector<1x128xf32>
    %28 = vector.broadcast %20 : vector<1x128xf32> to vector<24x128xf32>
    %29 = arith.subf %16, %28 : vector<24x128xf32>
    %cst_20 = arith.constant 9.99999974E-6 : f32
    %30 = vector.broadcast %cst_20 : f32 to vector<1x128xf32>
    %31 = arith.addf %27, %30 : vector<1x128xf32>
    %32 = math.rsqrt %31 : vector<1x128xf32>
    %33 = vector.broadcast %32 : vector<1x128xf32> to vector<24x128xf32>
    %34 = arith.mulf %29, %33 : vector<24x128xf32>
    %cst_21 = arith.constant 0.000000e+00 : f32
    %35 = vector.broadcast %cst_21 : f32 to vector<24x128xf32>
    %36 = arith.maximumf %34, %35 : vector<24x128xf32>
    %c0_22 = arith.constant 0 : index
    %c0_23 = arith.constant 0 : index
    %37 = vector.load %arg8[%c0_22, %c0_23] : memref<128x128xf32, #tpu.memory_space<vmem>>, vector<128x128xf32>
    %cst_24 = arith.constant dense<0.000000e+00> : vector<24x128xf32>
    %38 = tpu.matmul %36, %37, %cst_24 {dimension_numbers = #tpu.dot_dimension_numbers<[1], [0], [0], [1], [0, 0, 1, 1], [], []>} : vector<24x128xf32>, vector<128x128xf32>, vector<24x128xf32> -> vector<24x128xf32>
    %c0_25 = arith.constant 0 : index
    %c0_26 = arith.constant 0 : index
    %39 = vector.load %arg9[%c0_25, %c0_26] : memref<1x128xf32, #tpu.memory_space<vmem>>, vector<1x128xf32>
    %40 = vector.broadcast %39 : vector<1x128xf32> to vector<24x128xf32>
    %41 = arith.addf %38, %40 : vector<24x128xf32>
    %cst_27 = arith.constant 0.000000e+00 : f32
    %42 = vector.broadcast %cst_27 : f32 to vector<24x128xf32>
    %43 = arith.maximumf %41, %42 : vector<24x128xf32>
    %c0_28 = arith.constant 0 : index
    %c0_29 = arith.constant 0 : index
    %44 = vector.load %arg2[%c0_28, %c0_29] : memref<24x128xf32, #tpu.memory_space<vmem>>, vector<24x128xf32>
    %45 = arith.addf %36, %44 : vector<24x128xf32>
    %46 = arith.addf %45, %43 : vector<24x128xf32>
    %c0_30 = arith.constant 0 : index
    %c0_31 = arith.constant 0 : index
    %47 = vector.load %arg10[%c0_30, %c0_31] : memref<24x128xf32, #tpu.memory_space<vmem>>, vector<24x128xf32>
    tpu.vector_store %arg10[%c0_30, %c0_31], %46 {strides = array<i32>} : memref<24x128xf32, #tpu.memory_space<vmem>>, vector<24x128xf32>,
    return
  }
}

module attributes {stable_mosaic.version = 11 : i64} {
  func.func @bn_node_kernel(%arg0: i32, %arg1: memref<128x128xf32, #tpu.memory_space<vmem>>, %arg2: memref<1x128xf32, #tpu.memory_space<vmem>>, %arg3: memref<1x128xf32, #tpu.memory_space<vmem>>, %arg4: memref<128x128xf32, #tpu.memory_space<vmem>>, %arg5: memref<128x128xf32, #tpu.memory_space<vmem>>) attributes {dimension_semantics = [#tpu.dimension_semantics<parallel>], iteration_bounds = array<i64: 1>, scalar_prefetch = 0 : i64, scratch_operands = 0 : i64, tpu.core_type = #tpu.core_type<tc>, window_params = [{transform_indices = @transform_0, window_bounds = array<i64: 128, 128>}, {pipeline_mode = #tpu.pipeline_mode<synchronous>, transform_indices = @transform_1, window_bounds = array<i64: 1, 128>}, {pipeline_mode = #tpu.pipeline_mode<synchronous>, transform_indices = @transform_2, window_bounds = array<i64: 1, 128>}, {transform_indices = @transform_3, window_bounds = array<i64: 128, 128>}, {transform_indices = @transform_4, window_bounds = array<i64: 128, 128>}]} {
    %c0 = arith.constant 0 : index
    %c0_0 = arith.constant 0 : index
    %0 = vector.load %arg2[%c0, %c0_0] : memref<1x128xf32, #tpu.memory_space<vmem>>, vector<1x128xf32>
    %cst = arith.constant dense<0.000000e+00> : vector<128xf32>
    %1 = vector.multi_reduction <add>, %0, %cst [0] : vector<1x128xf32> to vector<128xf32>
    %2 = vector.shape_cast %1 : vector<128xf32> to vector<1x128xf32>
    %cst_1 = arith.constant 6.250000e-02 : f32
    %3 = vector.broadcast %cst_1 : f32 to vector<1x128xf32>
    %4 = arith.mulf %2, %3 : vector<1x128xf32>
    %c0_2 = arith.constant 0 : index
    %c0_3 = arith.constant 0 : index
    %5 = vector.load %arg3[%c0_2, %c0_3] : memref<1x128xf32, #tpu.memory_space<vmem>>, vector<1x128xf32>
    %cst_4 = arith.constant dense<0.000000e+00> : vector<128xf32>
    %6 = vector.multi_reduction <add>, %5, %cst_4 [0] : vector<1x128xf32> to vector<128xf32>
    %7 = vector.shape_cast %6 : vector<128xf32> to vector<1x128xf32>
    %cst_5 = arith.constant 6.250000e-02 : f32
    %8 = vector.broadcast %cst_5 : f32 to vector<1x128xf32>
    %9 = arith.mulf %7, %8 : vector<1x128xf32>
    %10 = arith.mulf %4, %4 : vector<1x128xf32>
    %11 = arith.subf %9, %10 : vector<1x128xf32>
    %cst_6 = arith.constant 0.000000e+00 : f32
    %12 = vector.broadcast %cst_6 : f32 to vector<1x128xf32>
    %13 = arith.maximumf %11, %12 : vector<1x128xf32>
    %c0_7 = arith.constant 0 : index
    %c0_8 = arith.constant 0 : index
    %14 = vector.load %arg1[%c0_7, %c0_8] : memref<128x128xf32, #tpu.memory_space<vmem>>, vector<128x128xf32>
    %15 = vector.broadcast %4 : vector<1x128xf32> to vector<128x128xf32>
    %16 = arith.subf %14, %15 : vector<128x128xf32>
    %cst_9 = arith.constant 9.99999974E-6 : f32
    %17 = vector.broadcast %cst_9 : f32 to vector<1x128xf32>
    %18 = arith.addf %13, %17 : vector<1x128xf32>
    %19 = math.rsqrt %18 : vector<1x128xf32>
    %20 = vector.broadcast %19 : vector<1x128xf32> to vector<128x128xf32>
    %21 = arith.mulf %16, %20 : vector<128x128xf32>
    %cst_10 = arith.constant 0.000000e+00 : f32
    %22 = vector.broadcast %cst_10 : f32 to vector<128x128xf32>
    %23 = arith.maximumf %21, %22 : vector<128x128xf32>
    %c0_11 = arith.constant 0 : index
    %c0_12 = arith.constant 0 : index
    %24 = vector.load %arg4[%c0_11, %c0_12] : memref<128x128xf32, #tpu.memory_space<vmem>>, vector<128x128xf32>
    %25 = arith.addf %23, %24 : vector<128x128xf32>
    %c0_13 = arith.constant 0 : index
    %c0_14 = arith.constant 0 : index
    %26 = vector.load %arg5[%c0_13, %c0_14] : memref<128x128xf32, #tpu.memory_space<vmem>>, vector<128x128xf32>
    tpu.vector_store %arg5[%c0_13, %c0_14], %25 {strides = array<i32>} : memref<128x128xf32, #tpu.memory_space<vmem>>, vector<128x128xf32>,
    return
  }
  func.func @transform_0(%arg0: i32) -> (i32, i32) {
    %c0_i32 = arith.constant 0 : i32
    %c0_i32_0 = arith.constant 0 : i32
    return %arg0, %c0_i32 : i32, i32
  }
  func.func @transform_1(%arg0: i32) -> (i32, i32) {
    %c0_i32 = arith.constant 0 : i32
    %c0_i32_0 = arith.constant 0 : i32
    %c0_i32_1 = arith.constant 0 : i32
    return %c0_i32, %c0_i32_0 : i32, i32
  }
  func.func @transform_2(%arg0: i32) -> (i32, i32) {
    %c0_i32 = arith.constant 0 : i32
    %c0_i32_0 = arith.constant 0 : i32
    %c0_i32_1 = arith.constant 0 : i32
    return %c0_i32, %c0_i32_0 : i32, i32
  }
  func.func @transform_3(%arg0: i32) -> (i32, i32) {
    %c0_i32 = arith.constant 0 : i32
    %c0_i32_0 = arith.constant 0 : i32
    return %arg0, %c0_i32 : i32, i32
  }
  func.func @transform_4(%arg0: i32) -> (i32, i32) {
    %c0_i32 = arith.constant 0 : i32
    %c0_i32_0 = arith.constant 0 : i32
    return %arg0, %c0_i32 : i32, i32
  }
}

module attributes {stable_mosaic.version = 11 : i64} {
  func.func @gcn_agg_kernel(%arg0: i32, %arg1: i32, %arg2: memref<128x8xf32, #tpu.memory_space<vmem>>, %arg3: memref<128x128xbf16, #tpu.memory_space<vmem>>, %arg4: memref<8x128xf32, #tpu.memory_space<vmem>>, %arg5: memref<1x128xf32, #tpu.memory_space<vmem>>, %arg6: memref<128x1xf32, #tpu.memory_space<vmem>>, %arg7: memref<128x128xf32, #tpu.memory_space<vmem>>, %arg8: memref<1x128xf32, #tpu.memory_space<vmem>>, %arg9: memref<1x128xf32, #tpu.memory_space<vmem>>) attributes {dimension_semantics = [#tpu.dimension_semantics<parallel>, #tpu.dimension_semantics<arbitrary>], iteration_bounds = array<i64: 1, 1>, scalar_prefetch = 0 : i64, scratch_operands = 0 : i64, tpu.core_type = #tpu.core_type<tc>, window_params = [{transform_indices = @transform_0, window_bounds = array<i64: 128, 8>}, {transform_indices = @transform_1, window_bounds = array<i64: 128, 128>}, {pipeline_mode = #tpu.pipeline_mode<synchronous>, transform_indices = @transform_2, window_bounds = array<i64: 8, 128>}, {pipeline_mode = #tpu.pipeline_mode<synchronous>, transform_indices = @transform_3, window_bounds = array<i64: 1, 128>}, {transform_indices = @transform_4, window_bounds = array<i64: 128, 1>}, {transform_indices = @transform_5, window_bounds = array<i64: 128, 128>}, {transform_indices = @transform_6, window_bounds = array<i64: 1, 128>}, {transform_indices = @transform_7, window_bounds = array<i64: 1, 128>}]} {
    %c0_i32 = arith.constant 0 : i32
    %0 = arith.cmpi eq, %arg1, %c0_i32 : i32
    %1 = arith.extui %0 : i1 to i32
    %c0_i32_0 = arith.constant 0 : i32
    %2 = arith.cmpi ne, %1, %c0_i32_0 : i32
    scf.if %2 {
      %cst_13 = arith.constant 0.000000e+00 : f32
      %15 = vector.broadcast %cst_13 : f32 to vector<128x128xf32>
      %c0_14 = arith.constant 0 : index
      %c0_15 = arith.constant 0 : index
      %16 = vector.load %arg7[%c0_14, %c0_15] : memref<128x128xf32, #tpu.memory_space<vmem>>, vector<128x128xf32>
      tpu.vector_store %arg7[%c0_14, %c0_15], %15 {strides = array<i32>} : memref<128x128xf32, #tpu.memory_space<vmem>>, vector<128x128xf32>,
    } else {
    }
    %c0 = arith.constant 0 : index
    %c0_1 = arith.constant 0 : index
    %3 = vector.load %arg2[%c0, %c0_1] : memref<128x8xf32, #tpu.memory_space<vmem>>, vector<128x8xf32>
    %c0_2 = arith.constant 0 : index
    %c0_3 = arith.constant 0 : index
    %4 = vector.load %arg4[%c0_2, %c0_3] : memref<8x128xf32, #tpu.memory_space<vmem>>, vector<8x128xf32>
    %cst = arith.constant dense<0.000000e+00> : vector<128x128xf32>
    %5 = tpu.matmul %3, %4, %cst {dimension_numbers = #tpu.dot_dimension_numbers<[1], [0], [0], [1], [0, 0, 1, 1], [], []>} : vector<128x8xf32>, vector<8x128xf32>, vector<128x128xf32> -> vector<128x128xf32>
    %c0_4 = arith.constant 0 : index
    %c0_5 = arith.constant 0 : index
    %6 = vector.load %arg7[%c0_4, %c0_5] : memref<128x128xf32, #tpu.memory_space<vmem>>, vector<128x128xf32>
    %c0_6 = arith.constant 0 : index
    %c0_7 = arith.constant 0 : index
    %7 = vector.load %arg3[%c0_6, %c0_7] : memref<128x128xbf16, #tpu.memory_space<vmem>>, vector<128x128xbf16>
    %8 = arith.truncf %5 : vector<128x128xf32> to vector<128x128xbf16>
    %cst_8 = arith.constant dense<0.000000e+00> : vector<128x128xf32>
    %9 = tpu.matmul %7, %8, %cst_8 {dimension_numbers = #tpu.dot_dimension_numbers<[1], [0], [0], [1], [0, 0, 1, 1], [], []>} : vector<128x128xbf16>, vector<128x128xbf16>, vector<128x128xf32> -> vector<128x128xf32>
    %10 = arith.addf %6, %9 : vector<128x128xf32>
    %c0_9 = arith.constant 0 : index
    %c0_10 = arith.constant 0 : index
    %11 = vector.load %arg7[%c0_9, %c0_10] : memref<128x128xf32, #tpu.memory_space<vmem>>, vector<128x128xf32>
    tpu.vector_store %arg7[%c0_9, %c0_10], %10 {strides = array<i32>} : memref<128x128xf32, #tpu.memory_space<vmem>>, vector<128x128xf32>,
    %c0_i32_11 = arith.constant 0 : i32
    %12 = arith.cmpi eq, %arg1, %c0_i32_11 : i32
    %13 = arith.extui %12 : i1 to i32
    %c0_i32_12 = arith.constant 0 : i32
    %14 = arith.cmpi ne, %13, %c0_i32_12 : i32
    scf.if %14 {
      %c0_13 = arith.constant 0 : index
      %c0_14 = arith.constant 0 : index
      %15 = vector.load %arg7[%c0_13, %c0_14] : memref<128x128xf32, #tpu.memory_space<vmem>>, vector<128x128xf32>
      %c0_15 = arith.constant 0 : index
      %c0_16 = arith.constant 0 : index
      %16 = vector.load %arg5[%c0_15, %c0_16] : memref<1x128xf32, #tpu.memory_space<vmem>>, vector<1x128xf32>
      %17 = vector.broadcast %16 : vector<1x128xf32> to vector<128x128xf32>
      %18 = arith.addf %15, %17 : vector<128x128xf32>
      %c0_17 = arith.constant 0 : index
      %c0_18 = arith.constant 0 : index
      %19 = vector.load %arg6[%c0_17, %c0_18] : memref<128x1xf32, #tpu.memory_space<vmem>>, vector<128x1xf32>
      %20 = vector.broadcast %19 : vector<128x1xf32> to vector<128x128xf32>
      %21 = arith.mulf %18, %20 : vector<128x128xf32>
      %c0_19 = arith.constant 0 : index
      %c0_20 = arith.constant 0 : index
      %22 = vector.load %arg7[%c0_19, %c0_20] : memref<128x128xf32, #tpu.memory_space<vmem>>, vector<128x128xf32>
      tpu.vector_store %arg7[%c0_19, %c0_20], %21 {strides = array<i32>} : memref<128x128xf32, #tpu.memory_space<vmem>>, vector<128x128xf32>,
      %cst_21 = arith.constant dense<0.000000e+00> : vector<128xf32>
      %23 = vector.multi_reduction <add>, %21, %cst_21 [0] : vector<128x128xf32> to vector<128xf32>
      %24 = vector.shape_cast %23 : vector<128xf32> to vector<1x128xf32>
      %c0_22 = arith.constant 0 : index
      %c0_23 = arith.constant 0 : index
      %25 = vector.load %arg8[%c0_22, %c0_23] : memref<1x128xf32, #tpu.memory_space<vmem>>, vector<1x128xf32>
      tpu.vector_store %arg8[%c0_22, %c0_23], %24 {strides = array<i32>} : memref<1x128xf32, #tpu.memory_space<vmem>>, vector<1x128xf32>,
      %26 = arith.mulf %21, %21 : vector<128x128xf32>
      %cst_24 = arith.constant dense<0.000000e+00> : vector<128xf32>
      %27 = vector.multi_reduction <add>, %26, %cst_24 [0] : vector<128x128xf32> to vector<128xf32>
      %28 = vector.shape_cast %27 : vector<128xf32> to vector<1x128xf32>
      %c0_25 = arith.constant 0 : index
      %c0_26 = arith.constant 0 : index
      %29 = vector.load %arg9[%c0_25, %c0_26] : memref<1x128xf32, #tpu.memory_space<vmem>>, vector<1x128xf32>
      tpu.vector_store %arg9[%c0_25, %c0_26], %28 {strides = array<i32>} : memref<1x128xf32, #tpu.memory_space<vmem>>, vector<1x128xf32>,
    } else {
    }
    return
  }
  func.func @transform_0(%arg0: i32, %arg1: i32) -> (i32, i32) {
    %c0_i32 = arith.constant 0 : i32
    %c0_i32_0 = arith.constant 0 : i32
    return %arg1, %c0_i32 : i32, i32
  }
  func.func @transform_1(%arg0: i32, %arg1: i32) -> (i32, i32) {
    %c0_i32 = arith.constant 0 : i32
    return %arg0, %arg1 : i32, i32
  }
  func.func @transform_2(%arg0: i32, %arg1: i32) -> (i32, i32) {
    %c0_i32 = arith.constant 0 : i32
    %c0_i32_0 = arith.constant 0 : i32
    %c0_i32_1 = arith.constant 0 : i32
    return %c0_i32, %c0_i32_0 : i32, i32
  }
  func.func @transform_3(%arg0: i32, %arg1: i32) -> (i32, i32) {
    %c0_i32 = arith.constant 0 : i32
    %c0_i32_0 = arith.constant 0 : i32
    %c0_i32_1 = arith.constant 0 : i32
    return %c0_i32, %c0_i32_0 : i32, i32
  }
  func.func @transform_4(%arg0: i32, %arg1: i32) -> (i32, i32) {
    %c0_i32 = arith.constant 0 : i32
    %c0_i32_0 = arith.constant 0 : i32
    return %arg0, %c0_i32 : i32, i32
  }
  func.func @transform_5(%arg0: i32, %arg1: i32) -> (i32, i32) {
    %c0_i32 = arith.constant 0 : i32
    %c0_i32_0 = arith.constant 0 : i32
    return %arg0, %c0_i32 : i32, i32
  }
  func.func @transform_6(%arg0: i32, %arg1: i32) -> (i32, i32) {
    %c0_i32 = arith.constant 0 : i32
    %c0_i32_0 = arith.constant 0 : i32
    return %arg0, %c0_i32 : i32, i32
  }
  func.func @transform_7(%arg0: i32, %arg1: i32) -> (i32, i32) {
    %c0_i32 = arith.constant 0 : i32
    %c0_i32_0 = arith.constant 0 : i32
    return %arg0, %c0_i32 : i32, i32
  }
}

</mosaic_0001>

<bundles_post_ra>
// kernel: res_egblk_0_forward.3
= control target key start
LH: loop header
LB: loop body
LE: loop exit
PB: predicated region body
PF: predicated region fallthrough
CT: control target
= control target key end

     0   :  { %vm46_vm0 = vcmask 64512   ;;  %v618_v0 = vmov 0.0   ;;  %vm619_vm1 = vmmov 0   ;;  %vm155_vm2 = vcmask 1043456   ;;  %s830_s3 = inlined_call_operand.vmem [shape: f32[8,8], index: 3, kind: input, shape index: {}]   ;;  %s831_s0 = inlined_call_operand.vmem [shape: f32[24,8], index: 0, kind: input, shape index: {}]   ;;  %s832_s6 = inlined_call_operand.vmem [shape: f32[12,128], index: 6, kind: input, shape index: {}]   ;;  %s833_s1 = inlined_call_operand.vmem [shape: f32[24,12], index: 1, kind: input, shape index: {}]   ;;  %s834_s5 = inlined_call_operand.vmem [shape: f32[8,128], index: 5, kind: input, shape index: {}]   ;;  %s835_s4 = inlined_call_operand.vmem [shape: f32[1,8], index: 4, kind: input, shape index: {}]   ;;  %s836_s8 = inlined_call_operand.vmem [shape: f32[128,128], index: 8, kind: input, shape index: {}]   ;;  %s837_s7 = inlined_call_operand.vmem [shape: f32[1,128], index: 7, kind: input, shape index: {}]   ;;  %s838_s9 = inlined_call_operand.vmem [shape: f32[1,128], index: 9, kind: input, shape index: {}]   ;;  %s839_s2 = inlined_call_operand.vmem [shape: f32[24,128], index: 2, kind: input, shape index: {}]   ;;  %s840_s10 = inlined_call_operand.vmem [shape: f32[24,128], index: 10, kind: output, shape index: {}]  }
   0x1   :  { %538 = vmatprep.subr.mxu0 %v618_v0  ;;  %v38_v1 = vld [vmem:[%s830_s3] sm:$0xff]  ;;  %540 = vmatprep.mubr.msk.f32.mxu0 %vm619_vm1, %v618_v0  ;;  %v144_v3 = vld [vmem:[%s832_s6 + $0x8] sm:$0xf]  ;;  %v37_v6 = vld [vmem:[%s831_s0 + $0x10] sm:$0xff]  ;;  %vm145_vm3 = vcmask 97280  }
   0x2   :  { %v35_v2 = vld [vmem:[%s831_s0] sm:$0xff]  ;;  %539 = vmatpush3.msra.mxu0 %v38_v1  ;;  %573 = vmatprep.subr.mxu1 %v618_v0  ;;  %v36_v5 = vld [vmem:[%s831_s0 + $0x8] sm:$0xff]  ;;  %v142_v10 = vld [vmem:[%s833_s1 + $0x10] sm:$0xff] }
   0x3   :  { %541 = vmatmul.mubr.msk.f32.vlgmr.msra.gmra.mxu0 %vm46_vm0, %v35_v2  ;;  %549 = vmatprep.subr.mxu0 %v618_v0  ;;  %v143_v4 = vld [vmem:[%s832_s6] sm:$0xff]  ;;  %v141_v9 = vld [vmem:[%s833_s1 + $0x8] sm:$0xff]  ;;  %v386_v30 = vld [vmem:[%s836_s8 + $0x78] sm:$0xff] }
   0x4   :  { %543 = vmatprep.mubr.msk.f32.mxu0 %vm619_vm1, %v618_v0  ;;  %550 = vmatpush3.msk.msra.mxu0 %vm155_vm2, %v144_v3  ;;  %v140_v7 = vld [vmem:[%s833_s1] sm:$0xff]  ;;  %v385_v31 = vld [vmem:[%s836_s8 + $0x70] sm:$0xff]  ;;  %v384_v32 = vld [vmem:[%s836_s8 + $0x68] sm:$0xff] }
   0x5   :  { %551 = vmatprep.subr.mxu0 %v618_v0  ;;  %605 = vmatprep.mubr.msk.f32.mxu1 %vm619_vm1, %v618_v0  ;;  %v139_v8 = vld [vmem:[%s834_s5] sm:$0xff]  ;;  %v382_v34 = vld [vmem:[%s836_s8 + $0x58] sm:$0xff]  ;;  %v381_v35 = vld [vmem:[%s836_s8 + $0x50] sm:$0xff] }
   0x6   :  { %552 = vmatpush3.msra.mxu0 %v143_v4  ;;  %v493_v11 = vld [vmem:[%s835_s4] ss:$0 sm:$0xff]  ;;  %574 = vmatpush3.msra.mxu1 %v386_v30  ;;  %v380_v36 = vld [vmem:[%s836_s8 + $0x48] sm:$0xff]  ;;  %v378_v38 = vld [vmem:[%s836_s8 + $0x38] sm:$0xff] }
   0x7   :  { %544 = vmatmul.mubr.msk.f32.gmra.mxu0 %vm46_vm0, %v36_v5  ;;  %562 = vmatprep.subr.mxu0 %v618_v0  ;;  %v383_v33 = vld [vmem:[%s836_s8 + $0x60] sm:$0xff]  ;;  %v377_v39 = vld [vmem:[%s836_s8 + $0x30] sm:$0xff]  ;;  %v376_v40 = vld [vmem:[%s836_s8 + $0x28] sm:$0xff] }
   0x8   :  { %546 = vmatprep.mubr.msk.f32.mxu0 %vm619_vm1, %v618_v0  ;;  %575 = vmatprep.subr.mxu1 %v618_v0  ;;  %v379_v37 = vld [vmem:[%s836_s8 + $0x40] sm:$0xff]  ;;  %v374_v42 = vld [vmem:[%s836_s8 + $0x18] sm:$0xff]  ;;  %v373_v43 = vld [vmem:[%s836_s8 + $0x10] sm:$0xff] }
   0x9   :  { %576 = vmatpush3.msra.mxu1 %v385_v31  ;;  %v375_v41 = vld [vmem:[%s836_s8 + $0x20] sm:$0xff]  ;;  %v372_v44 = vld [vmem:[%s836_s8 + $0x8] sm:$0xff] }
   0xa   :  { %577 = vmatprep.subr.mxu1 %v618_v0  ;;  %v371_v45 = vld [vmem:[%s836_s8] sm:$0xff] }
   0xb   :  { %547 = vmatmul.mubr.msk.f32.gmra.mxu0 %vm46_vm0, %v37_v6  ;;  %578 = vmatpush3.msra.mxu1 %v384_v32  ;;  %v504_v51 = vld [vmem:[%s837_s7] ss:$0 sm:$0xff] }
   0xc   :  { %553 = vmatprep.mubr.msk.f32.mxu0 %vm619_vm1, %v618_v0  ;;  %579 = vmatprep.subr.mxu1 %v618_v0  ;;  %v477_v30 = vld [vmem:[%s839_s2] sm:$0xff] }
   0xd   :  { %580 = vmatpush3.msra.mxu1 %v383_v33 }
   0xe   :  { %581 = vmatprep.subr.mxu1 %v618_v0 }
   0xf   :  { %554 = vmatmul.mubr.msk.f32.vlgmr.msra.gmra.mxu0 %vm145_vm3, %v140_v7  ;;  %582 = vmatpush3.msra.mxu1 %v382_v34 }
  0x10   :  { %563 = vmatpush3.msra.mxu0 %v139_v8  ;;  %556 = vmatprep.mubr.msk.f32.mxu0 %vm619_vm1, %v618_v0 }
  0x11   :  { %583 = vmatprep.subr.mxu1 %v618_v0 }
  0x12   :  { %584 = vmatpush3.msra.mxu1 %v381_v35 }
  0x13   :  { %557 = vmatmul.mubr.msk.f32.gmra.mxu0 %vm145_vm3, %v141_v9  ;;  %585 = vmatprep.subr.mxu1 %v618_v0 }
  0x14   :  { %559 = vmatprep.mubr.msk.f32.mxu0 %vm619_vm1, %v618_v0  ;;  %586 = vmatpush3.msra.mxu1 %v380_v36 }
  0x15   :  { %587 = vmatprep.subr.mxu1 %v618_v0 }
  0x16   :  { %588 = vmatpush3.msra.mxu1 %v379_v37 }
  0x17   :  { %560 = vmatmul.mubr.msk.f32.gmra.mxu0 %vm145_vm3, %v142_v10  ;;  %589 = vmatprep.subr.mxu1 %v618_v0 }
  0x18   :  { %564 = vmatprep.mubr.msk.f32.mxu0 %vm619_vm1, %v618_v0  ;;  %590 = vmatpush3.msra.mxu1 %v378_v38 }
  0x19   :  { %591 = vmatprep.subr.mxu1 %v618_v0 }
  0x1a   :  { %592 = vmatpush3.msra.mxu1 %v377_v39 }
  0x1b   :  { %593 = vmatprep.subr.mxu1 %v618_v0 }
  0x1c   :  { %594 = vmatpush3.msra.mxu1 %v376_v40 }
  0x1d   :  { %595 = vmatprep.subr.mxu1 %v618_v0 }
  0x1e   :  { %596 = vmatpush3.msra.mxu1 %v375_v41 }
  0x1f   :  { %597 = vmatprep.subr.mxu1 %v618_v0 }
  0x20   :  { %598 = vmatpush3.msra.mxu1 %v374_v42  ;;  %v479_v42 = vld [vmem:[%s839_s2 + $0x10] sm:$0xff] }
  0x21   :  { %599 = vmatprep.subr.mxu1 %v618_v0 }
  0x22   :  { %600 = vmatpush3.msra.mxu1 %v373_v43 }
  0x23   :  { %601 = vmatprep.subr.mxu1 %v618_v0 }
  0x24   :  { %602 = vmatpush3.msra.mxu1 %v372_v44 }
  0x25   :  { %603 = vmatprep.subr.mxu1 %v618_v0 }
  0x26   :  { %604 = vmatpush3.msra.mxu1 %v371_v45 }
  0xc3   :  { %v122_v12 = vpop.f32.mrf.mxu0 }
  0xc4   :  { %v123_v13 = vadd.f32 %v493_v11, %v122_v12 }
  0xc5   :  { %v542_v14 = vpop.f32.mrf.mxu0 }
  0xc6   :  { %v136_v15 = vmax.f32 %v123_v13, 0.0 }
  0xc7   :  { %v127_v16 = vpop.f32.mrf.mxu0 }
  0xc8   :  { %v128_v17 = vadd.f32 %v493_v11, %v127_v16  ;;  %565 = vmatmul.mubr.msk.f32.vlgmr.msra.gmra.mxu0 %vm46_vm0, %v136_v15 }
  0xc9   :  { %v545_v18 = vpop.f32.mrf.mxu0  ;;  %567 = vmatprep.mubr.msk.f32.mxu0 %vm619_vm1, %v618_v0 }
  0xca   :  { %v137_v19 = vmax.f32 %v128_v17, 0.0 }
  0xcb   :  { %v132_v20 = vpop.f32.mrf.mxu0 }
  0xcc   :  { %v133_v21 = vadd.f32 %v493_v11, %v132_v20  ;;  %568 = vmatmul.mubr.msk.f32.gmra.mxu0 %vm46_vm0, %v137_v19 }
  0xcd   :  { %v548_v22 = vpop.f32.mrf.mxu0  ;;  %570 = vmatprep.mubr.msk.f32.mxu0 %vm619_vm1, %v618_v0 }
  0xce   :  { %v138_v23 = vmax.f32 %v133_v21, 0.0 }
  0xcf   :  { %v225_v24 = vpop.f32.mrf.mxu0 }
  0xd0   :  { %571 = vmatmul.mubr.msk.f32.gmra.mxu0 %vm46_vm0, %v138_v23 }
  0xd1   :  { %v555_v25 = vpop.f32.mrf.mxu0 }
  0xd3   :  { %v230_v26 = vpop.f32.mrf.mxu0 }
  0xd5   :  { %v558_v27 = vpop.f32.mrf.mxu0 }
  0xd7   :  { %v235_v28 = vpop.f32.mrf.mxu0 }
  0xd9   :  { %v561_v29 = vpop.f32.mrf.mxu0 }
 0x188   :  { %v314_v46 = vpop.f32.mrf.mxu0 }
 0x189   :  { %v315_v49 = vadd.f32 %v314_v46, %v225_v24 }
 0x18a   :  { %v566_v47 = vpop.f32.mrf.mxu0 }
 0x18b   :  { %v335_v55 = vadd.f32 %v504_v51, %v315_v49 }
 0x18c   :  { %v319_v48 = vpop.f32.mrf.mxu0 }
 0x18d   :  { %v320_v50 = vadd.f32 %v319_v48, %v230_v26 }
 0x18e   :  { %v569_v52 = vpop.f32.mrf.mxu0 }
 0x18f   :  { %v336_v53 = vadd.f32 %v504_v51, %v320_v50 }
 0x190   :  { %v324_v54 = vpop.f32.mrf.mxu0 }
 0x191   :  { %v325_v56 = vadd.f32 %v324_v54, %v235_v28  ;;  %v338_v58 = vadd.f32 %v336_v53, %v335_v55  ;;  %v505_v28 = vld [vmem:[%s838_s9] ss:$0 sm:$0xff] }
 0x192   :  { %v572_v57 = vpop.f32.mrf.mxu0 }
 0x193   :  { %v337_v59 = vadd.f32 %v504_v51, %v325_v56 }
 0x195   :  { %v339_v60 = vadd.f32 %v338_v58, %v337_v59 }
 0x197   :  { %v340_v61 = vrot.slane %v339_v60, 4 }
 0x199   :  { %v341_v62 = vadd.f32 %v340_v61, %v339_v60 }
 0x19b   :  { %v342_v63 = vrot.slane %v341_v62, 2 }
 0x19d   :  { %v343_v1 = vadd.f32 %v342_v63, %v341_v62 }
 0x19f   :  { %v344_v2 = vrot.slane %v343_v1, 1 }
 0x1a1   :  { %v345_v3 = vadd.f32 %v344_v2, %v343_v1 }
 0x1a3   :  { %v347_v4 = vmul.f32 0.041666668, %v345_v3 }
 0x1a5   :  { %v349_v5 = vsub.f32 %v336_v53, %v347_v4  ;;  %v350_v6 = vsub.f32 %v337_v59, %v347_v4  ;;  %v348_v7 = vsub.f32 %v335_v55, %v347_v4 }
 0x1a7   :  { %v351_v8 = vmul.f32 %v348_v7, %v348_v7  ;;  %v352_v9 = vmul.f32 %v349_v5, %v349_v5  ;;  %v353_v10 = vmul.f32 %v350_v6, %v350_v6 }
 0x1a9   :  { %v354_v11 = vadd.f32 %v352_v9, %v351_v8 }
 0x1ab   :  { %v355_v12 = vadd.f32 %v354_v11, %v353_v10 }
 0x1ad   :  { %v356_v13 = vrot.slane %v355_v12, 4 }
 0x1af   :  { %v357_v14 = vadd.f32 %v356_v13, %v355_v12 }
 0x1b1   :  { %v358_v15 = vrot.slane %v357_v14, 2 }
 0x1b3   :  { %v359_v16 = vadd.f32 %v358_v15, %v357_v14 }
 0x1b5   :  { %v360_v17 = vrot.slane %v359_v16, 1 }
 0x1b7   :  { %v361_v18 = vadd.f32 %v360_v17, %v359_v16 }
 0x1b9   :  { %v362_v19 = vmul.f32 0.041666668, %v361_v18 }
 0x1bb   :  { %v363_v20 = vadd.f32 1e-05, %v362_v19 }
 0x1bd   :  { %616 = vrsqrt.f32 %v363_v20 }
 0x1ca   :  { %v617_v21 = vpop.eup %616 }
 0x1cb   :  { %v365_v22 = vmul.f32 %v617_v21, %v348_v7  ;;  %v366_v24 = vmul.f32 %v617_v21, %v349_v5  ;;  %v367_v26 = vmul.f32 %v617_v21, %v350_v6 }
 0x1cd   :  { %v368_v23 = vmax.f32 %v365_v22, 0.0  ;;  %v369_v25 = vmax.f32 %v366_v24, 0.0  ;;  %v370_v27 = vmax.f32 %v367_v26, 0.0 }
 0x1cf   :  { %606 = vmatmul.mubr.f32.vlgmr.msra.gmra.mxu1 %v368_v23  ;;  %v480_v34 = vadd.f32 %v477_v30, %v368_v23  ;;  %v482_v47 = vadd.f32 %v479_v42, %v370_v27 }
 0x1d0   :  { %608 = vmatprep.mubr.msk.f32.mxu1 %vm619_vm1, %v618_v0 }
 0x1d3   :  { %609 = vmatmul.mubr.f32.gmra.mxu1 %v369_v25 }
 0x1d4   :  { %611 = vmatprep.mubr.msk.f32.mxu1 %vm619_vm1, %v618_v0  ;;  %v478_v0 = vld [vmem:[%s839_s2 + $0x8] sm:$0xff] }
 0x1d5   :  { %v481_v40 = vadd.f32 %v478_v0, %v369_v25 }
 0x1d7   :  { %612 = vmatmul.mubr.f32.gmra.mxu1 %v370_v27 }
 0x28f   :  { %v460_v29 = vpop.f32.mrf.mxu1 }
 0x290   :  { %v461_v31 = vadd.f32 %v505_v28, %v460_v29 }
 0x291   :  { %v607_v32 = vpop.f32.mrf.mxu1 }
 0x292   :  { %v474_v33 = vmax.f32 %v461_v31, 0.0 }
 0x293   :  { %v465_v35 = vpop.f32.mrf.mxu1 }
 0x294   :  { %v483_v36 = vadd.f32 %v480_v34, %v474_v33  ;;  %v466_v37 = vadd.f32 %v505_v28, %v465_v35 }
 0x295   :  { %v610_v38 = vpop.f32.mrf.mxu1 }
 0x296   :  { %486 = vst [vmem:[%s840_s10] sm:$0xff] %v483_v36  ;;  %v475_v39 = vmax.f32 %v466_v37, 0.0 }
 0x297   :  { %v470_v41 = vpop.f32.mrf.mxu1 }
 0x298   :  { %v484_v43 = vadd.f32 %v481_v40, %v475_v39  ;;  %v471_v44 = vadd.f32 %v505_v28, %v470_v41 }
 0x299   :  { %v613_v45 = vpop.f32.mrf.mxu1 }
 0x29a   :  { %487 = vst [vmem:[%s840_s10 + $0x8] sm:$0xff] %v484_v43  ;;  %v476_v46 = vmax.f32 %v471_v44, 0.0 }
 0x29c   :  { %v485_v48 = vadd.f32 %v482_v47, %v476_v46 }
 0x29e   :  { %488 = vst [vmem:[%s840_s10 + $0x10] sm:$0xff] %v485_v48 }

// kernel: res_egblk_0_forward.5
= control target key start
LH: loop header
LB: loop body
LE: loop exit
PB: predicated region body
PF: predicated region fallthrough
CT: control target
= control target key end

     0   :  { %v43_v6 = vlaneseq  ;;  %s375_s1 = inlined_call_operand.vmem [shape: f32[1,128], index: 1, kind: input, shape index: {}]   ;;  %s376_s2 = inlined_call_operand.vmem [shape: f32[1,128], index: 2, kind: input, shape index: {}]   ;;  %s377_s0 = inlined_call_operand.vmem [shape: f32[128,128], index: 0, kind: input, shape index: {}]   ;;  %s378_s3 = inlined_call_operand.vmem [shape: f32[128,128], index: 3, kind: input, shape index: {}]   ;;  %s379_s4 = inlined_call_operand.vmem [shape: f32[128,128], index: 4, kind: output, shape index: {}]  }
   0x1   :  { %v17_v0 = vld [vmem:[%s375_s1] sm:$0x1]  ;;  %v27_v13 = vld [vmem:[%s377_s0 + $0x8] sm:$0xff]  ;;  %v28_v14 = vld [vmem:[%s377_s0 + $0x10] sm:$0xff] }
   0x2   :  { %v20_v1 = vld [vmem:[%s376_s2] sm:$0x1]  ;;  %v19_v2 = vmul.f32 0.0625, %v17_v0  ;;  %v44_v9 = vshrl.u32 %v43_v6, 7  ;;  %v29_v15 = vld [vmem:[%s377_s0 + $0x18] sm:$0xff]  ;;  %v31_v17 = vld [vmem:[%s377_s0 + $0x28] sm:$0xff] }
   0x3   :  { %v22_v3 = vmul.f32 0.0625, %v20_v1  ;;  %v26_v11 = vld [vmem:[%s377_s0] sm:$0xff]  ;;  %v32_v18 = vld [vmem:[%s377_s0 + $0x30] sm:$0xff]  ;;  %v33_v19 = vld [vmem:[%s377_s0 + $0x38] sm:$0xff] }
   0x4   :  { %v23_v4 = vmul.f32 %v19_v2, %v19_v2  ;;  %v45_v10 = vsub.s32 0, %v44_v9  ;;  %v30_v16 = vld [vmem:[%s377_s0 + $0x20] sm:$0xff]  ;;  %v223_v21 = vld [vmem:[%s377_s0 + $0x48] sm:$0xff]  ;;  %v229_v23 = vld [vmem:[%s377_s0 + $0x50] sm:$0xff] }
   0x5   :  { %v218_v20 = vld [vmem:[%s377_s0 + $0x40] sm:$0xff]  ;;  %v234_v24 = vld [vmem:[%s377_s0 + $0x58] sm:$0xff]  ;;  %v248_v30 = vld [vmem:[%s377_s0 + $0x68] sm:$0xff] }
   0x6   :  { %v24_v5 = vsub.f32 %v22_v3, %v23_v4  ;;  %v192_v12 = vrot.slane %v19_v2, %v45_v10  ;;  %v239_v25 = vld [vmem:[%s377_s0 + $0x60] sm:$0xff]  ;;  %v253_v31 = vld [vmem:[%s377_s0 + $0x70] sm:$0xff]  ;;  %v258_v32 = vld [vmem:[%s377_s0 + $0x78] sm:$0xff] }
   0x7   :  { %v104_v47 = vld [vmem:[%s378_s3] sm:$0xff]  ;;  %v105_v49 = vld [vmem:[%s378_s3 + $0x8] sm:$0xff]  ;;  %v106_v51 = vld [vmem:[%s378_s3 + $0x10] sm:$0xff] }
   0x8   :  { %v25_v7 = vmax.f32 %v24_v5, 0.0  ;;  %v48_v22 = vsub.f32 %v26_v11, %v192_v12  ;;  %v49_v26 = vsub.f32 %v27_v13, %v192_v12  ;;  %v50_v27 = vsub.f32 %v28_v14, %v192_v12  ;;  %v107_v53 = vld [vmem:[%s378_s3 + $0x18] sm:$0xff]  ;;  %v108_v55 = vld [vmem:[%s378_s3 + $0x20] sm:$0xff]  ;;  %v109_v57 = vld [vmem:[%s378_s3 + $0x28] sm:$0xff] }
   0x9   :  { %v51_v28 = vsub.f32 %v29_v15, %v192_v12  ;;  %v52_v29 = vsub.f32 %v30_v16, %v192_v12  ;;  %v53_v34 = vsub.f32 %v31_v17, %v192_v12  ;;  %v54_v35 = vsub.f32 %v32_v18, %v192_v12  ;;  %v110_v0 = vld [vmem:[%s378_s3 + $0x30] sm:$0xff]  ;;  %v111_v1 = vld [vmem:[%s378_s3 + $0x38] sm:$0xff]  ;;  %v112_v15 = vld [vmem:[%s378_s3 + $0x40] sm:$0xff] }
   0xa   :  { %v64_v8 = vadd.f32 1e-05, %v25_v7  ;;  %v55_v36 = vsub.f32 %v33_v19, %v192_v12  ;;  %v56_v37 = vsub.f32 %v218_v20, %v192_v12  ;;  %v57_v39 = vsub.f32 %v223_v21, %v192_v12  ;;  %v113_v17 = vld [vmem:[%s378_s3 + $0x48] sm:$0xff]  ;;  %v114_v19 = vld [vmem:[%s378_s3 + $0x50] sm:$0xff]  ;;  %v115_v21 = vld [vmem:[%s378_s3 + $0x58] sm:$0xff] }
   0xb   :  { %v58_v40 = vsub.f32 %v229_v23, %v192_v12  ;;  %v59_v41 = vsub.f32 %v234_v24, %v192_v12  ;;  %v60_v42 = vsub.f32 %v239_v25, %v192_v12  ;;  %v61_v43 = vsub.f32 %v248_v30, %v192_v12  ;;  %v116_v23 = vld [vmem:[%s378_s3 + $0x60] sm:$0xff]  ;;  %v117_v25 = vld [vmem:[%s378_s3 + $0x68] sm:$0xff] }
   0xc   :  { %156 = vrsqrt.f32 %v64_v8  ;;  %v62_v44 = vsub.f32 %v253_v31, %v192_v12  ;;  %v63_v45 = vsub.f32 %v258_v32, %v192_v12  ;;  %v118_v32 = vld [vmem:[%s378_s3 + $0x70] sm:$0xff] }
  0x19   :  { %v157_v33 = vpop.eup %156 }
  0x1a   :  { %v70_v38 = vrot.slane %v157_v33, %v45_v10  ;;  %v119_v33 = vld [vmem:[%s378_s3 + $0x78] sm:$0xff] }
  0x1c   :  { %v72_v46 = vmul.f32 %v70_v38, %v48_v22  ;;  %v73_v48 = vmul.f32 %v70_v38, %v49_v26  ;;  %v74_v50 = vmul.f32 %v70_v38, %v50_v27  ;;  %v75_v52 = vmul.f32 %v70_v38, %v51_v28 }
  0x1d   :  { %v76_v54 = vmul.f32 %v70_v38, %v52_v29  ;;  %v77_v56 = vmul.f32 %v70_v38, %v53_v34  ;;  %v78_v58 = vmul.f32 %v70_v38, %v54_v35  ;;  %v79_v59 = vmul.f32 %v70_v38, %v55_v36 }
  0x1e   :  { %v88_v60 = vmax.f32 %v72_v46, 0.0  ;;  %v89_v61 = vmax.f32 %v73_v48, 0.0  ;;  %v90_v62 = vmax.f32 %v74_v50, 0.0  ;;  %v91_v63 = vmax.f32 %v75_v52, 0.0 }
  0x1f   :  { %v92_v2 = vmax.f32 %v76_v54, 0.0  ;;  %v93_v3 = vmax.f32 %v77_v56, 0.0  ;;  %v94_v4 = vmax.f32 %v78_v58, 0.0  ;;  %v95_v5 = vmax.f32 %v79_v59, 0.0 }
  0x20   :  { %v120_v6 = vadd.f32 %v104_v47, %v88_v60  ;;  %v121_v7 = vadd.f32 %v105_v49, %v89_v61  ;;  %v122_v8 = vadd.f32 %v106_v51, %v90_v62  ;;  %v123_v9 = vadd.f32 %v107_v53, %v91_v63 }
  0x21   :  { %v124_v10 = vadd.f32 %v108_v55, %v92_v2  ;;  %v125_v11 = vadd.f32 %v109_v57, %v93_v3  ;;  %v126_v12 = vadd.f32 %v110_v0, %v94_v4  ;;  %v127_v13 = vadd.f32 %v111_v1, %v95_v5 }
  0x22   :  { %136 = vst [vmem:[%s379_s4] sm:$0xff] %v120_v6  ;;  %137 = vst [vmem:[%s379_s4 + $0x8] sm:$0xff] %v121_v7  ;;  %v80_v14 = vmul.f32 %v70_v38, %v56_v37  ;;  %v81_v16 = vmul.f32 %v70_v38, %v57_v39  ;;  %v82_v18 = vmul.f32 %v70_v38, %v58_v40 }
  0x23   :  { %138 = vst [vmem:[%s379_s4 + $0x10] sm:$0xff] %v122_v8  ;;  %139 = vst [vmem:[%s379_s4 + $0x18] sm:$0xff] %v123_v9  ;;  %v83_v20 = vmul.f32 %v70_v38, %v59_v41  ;;  %v84_v22 = vmul.f32 %v70_v38, %v60_v42  ;;  %v85_v24 = vmul.f32 %v70_v38, %v61_v43 }
  0x24   :  { %140 = vst [vmem:[%s379_s4 + $0x20] sm:$0xff] %v124_v10  ;;  %141 = vst [vmem:[%s379_s4 + $0x28] sm:$0xff] %v125_v11  ;;  %v86_v26 = vmul.f32 %v70_v38, %v62_v44  ;;  %v87_v27 = vmul.f32 %v70_v38, %v63_v45  ;;  %v96_v28 = vmax.f32 %v80_v14, 0.0  ;;  %v97_v29 = vmax.f32 %v81_v16, 0.0 }
  0x25   :  { %142 = vst [vmem:[%s379_s4 + $0x30] sm:$0xff] %v126_v12  ;;  %143 = vst [vmem:[%s379_s4 + $0x38] sm:$0xff] %v127_v13  ;;  %v98_v30 = vmax.f32 %v82_v18, 0.0  ;;  %v99_v31 = vmax.f32 %v83_v20, 0.0  ;;  %v100_v34 = vmax.f32 %v84_v22, 0.0  ;;  %v101_v35 = vmax.f32 %v85_v24, 0.0 }
  0x26   :  { %v102_v36 = vmax.f32 %v86_v26, 0.0  ;;  %v103_v37 = vmax.f32 %v87_v27, 0.0  ;;  %v128_v39 = vadd.f32 %v112_v15, %v96_v28  ;;  %v129_v40 = vadd.f32 %v113_v17, %v97_v29 }
  0x27   :  { %v130_v41 = vadd.f32 %v114_v19, %v98_v30  ;;  %v131_v38 = vadd.f32 %v115_v21, %v99_v31  ;;  %v132_v42 = vadd.f32 %v116_v23, %v100_v34  ;;  %v133_v43 = vadd.f32 %v117_v25, %v101_v35 }
  0x28   :  { %v134_v44 = vadd.f32 %v118_v32, %v102_v36  ;;  %v135_v45 = vadd.f32 %v119_v33, %v103_v37  ;;  %144 = vst [vmem:[%s379_s4 + $0x40] sm:$0xff] %v128_v39  ;;  %145 = vst [vmem:[%s379_s4 + $0x48] sm:$0xff] %v129_v40 }
  0x29   :  { %146 = vst [vmem:[%s379_s4 + $0x50] sm:$0xff] %v130_v41  ;;  %147 = vst [vmem:[%s379_s4 + $0x58] sm:$0xff] %v131_v38 }
  0x2a   :  { %148 = vst [vmem:[%s379_s4 + $0x60] sm:$0xff] %v132_v42  ;;  %149 = vst [vmem:[%s379_s4 + $0x68] sm:$0xff] %v133_v43 }
  0x2b   :  { %150 = vst [vmem:[%s379_s4 + $0x70] sm:$0xff] %v134_v44  ;;  %151 = vst [vmem:[%s379_s4 + $0x78] sm:$0xff] %v135_v45 }

// kernel: res_egblk_0_forward.4
= control target key start
LH: loop header
LB: loop body
LE: loop exit
PB: predicated region body
PF: predicated region fallthrough
CT: control target
= control target key end

     0   :  { %vm61_vm0 = vcmask 64512   ;;  %v858_v19 = vmov 0   ;;  %s1119_s2 = inlined_call_operand.vmem [shape: f32[8,128], index: 2, kind: input, shape index: {}]   ;;  %s1120_s0 = inlined_call_operand.vmem [shape: f32[128,8], index: 0, kind: input, shape index: {}]   ;;  %s1121_s1 = inlined_call_operand.vmem [shape: bf16[128,128], index: 1, kind: input, shape index: {}]   ;;  %s1122_s4 = inlined_call_operand.vmem [shape: f32[128,1], index: 4, kind: input, shape index: {}]   ;;  %s1123_s3 = inlined_call_operand.vmem [shape: f32[1,128], index: 3, kind: input, shape index: {}]   ;;  %s1124_s5 = inlined_call_operand.vmem [shape: f32[128,128], index: 5, kind: output, shape index: {0}]   ;;  %s1125_s6 = inlined_call_operand.vmem [shape: f32[1,128], index: 6, kind: output, shape index: {1}]   ;;  %s1126_s7 = inlined_call_operand.vmem [shape: f32[1,128], index: 7, kind: output, shape index: {2}]  }
   0x1   :  { %v60_v0 = vld [vmem:[%s1119_s2] sm:$0xff]  ;;  %v45_v2 = vld [vmem:[%s1120_s0 + $0x8] sm:$0xff]  ;;  %v46_v3 = vld [vmem:[%s1120_s0 + $0x10] sm:$0xff]  ;;  %848 = vset.pattern.permute.xlu0 %v858_v19  ;;  %849 = vset.pattern.permute.xlu1 %v858_v19 }
   0x2   :  { %v44_v1 = vld [vmem:[%s1120_s0] sm:$0xff]  ;;  %772 = vmatprep.subr.mxu0 %v60_v0  ;;  %v47_v4 = vld [vmem:[%s1120_s0 + $0x18] sm:$0xff]  ;;  %v49_v6 = vld [vmem:[%s1120_s0 + $0x28] sm:$0xff] }
   0x3   :  { %774 = vmatprep.mubr.msk.f32.mxu0 %vm61_vm0, %v44_v1  ;;  %773 = vmatpush3.msra.mxu0 %v60_v0  ;;  %v48_v5 = vld [vmem:[%s1120_s0 + $0x20] sm:$0xff]  ;;  %v50_v7 = vld [vmem:[%s1120_s0 + $0x30] sm:$0xff]  ;;  %v51_v8 = vld [vmem:[%s1120_s0 + $0x38] sm:$0xff] }
   0x4   :  { %775 = vmatmul.mubr.msk.f32.vlgmr.msra.gmra.mxu0 %vm61_vm0, %v45_v2  ;;  %v52_v9 = vld [vmem:[%s1120_s0 + $0x40] sm:$0xff]  ;;  %v53_v10 = vld [vmem:[%s1120_s0 + $0x48] sm:$0xff]  ;;  %v54_v11 = vld [vmem:[%s1120_s0 + $0x50] sm:$0xff] }
   0x5   :  { %777 = vmatprep.mubr.msk.f32.mxu0 %vm61_vm0, %v46_v3  ;;  %v55_v12 = vld [vmem:[%s1120_s0 + $0x58] sm:$0xff]  ;;  %v56_v13 = vld [vmem:[%s1120_s0 + $0x60] sm:$0xff]  ;;  %v57_v14 = vld [vmem:[%s1120_s0 + $0x68] sm:$0xff] }
   0x6   :  { %v58_v15 = vld [vmem:[%s1120_s0 + $0x70] sm:$0xff]  ;;  %v59_v16 = vld [vmem:[%s1120_s0 + $0x78] sm:$0xff]  ;;  %v850_v17 = vld [vmem:[%s1121_s1] sm:$0xff]  }
   0x7   :  { %v851_v18 = vld [vmem:[%s1121_s1 + $0x10] sm:$0xff]   ;;  %v514_v20 = vld [vmem:[%s1122_s4] sm:$0xff]  ;;  %v515_v22 = vld [vmem:[%s1122_s4 + $0x8] sm:$0xff] }
   0x8   :  { %778 = vmatmul.mubr.msk.f32.gmra.mxu0 %vm61_vm0, %v47_v4  ;;  %818 = vmatprep.mubr.bf16.mxu1 %v851_v18  ;;  %v516_v21 = vld [vmem:[%s1122_s4 + $0x10] sm:$0xff]  ;;  %v517_v23 = vld [vmem:[%s1122_s4 + $0x18] sm:$0xff]  ;;  %v518_v24 = vld [vmem:[%s1122_s4 + $0x20] sm:$0xff] }
   0x9   :  { %780 = vmatprep.mubr.msk.f32.mxu0 %vm61_vm0, %v48_v5  ;;  %532 = vperm.xlu0 %848, %v514_v20   ;;  %v519_v25 = vld [vmem:[%s1122_s4 + $0x28] sm:$0xff]  ;;  %v520_v26 = vld [vmem:[%s1122_s4 + $0x30] sm:$0xff]  ;;  %v521_v27 = vld [vmem:[%s1122_s4 + $0x38] sm:$0xff] }
   0xa   :  { %542 = vperm.xlu1 %849, %v516_v21   ;;  %v522_v28 = vld [vmem:[%s1122_s4 + $0x40] sm:$0xff]  ;;  %v523_v29 = vld [vmem:[%s1122_s4 + $0x48] sm:$0xff]  ;;  %v524_v30 = vld [vmem:[%s1122_s4 + $0x50] sm:$0xff] }
   0xb   :  { %v525_v31 = vld [vmem:[%s1122_s4 + $0x58] sm:$0xff]  ;;  %v526_v32 = vld [vmem:[%s1122_s4 + $0x60] sm:$0xff]  ;;  %v527_v33 = vld [vmem:[%s1122_s4 + $0x68] sm:$0xff] }
   0xc   :  { %781 = vmatmul.mubr.msk.f32.gmra.mxu0 %vm61_vm0, %v49_v6  ;;  %v528_v34 = vld [vmem:[%s1122_s4 + $0x70] sm:$0xff]  ;;  %v529_v35 = vld [vmem:[%s1122_s4 + $0x78] sm:$0xff]  ;;  %v852_v60 = vld [vmem:[%s1121_s1 + $0x8] sm:$0xff]  }
   0xd   :  { %783 = vmatprep.mubr.msk.f32.mxu0 %vm61_vm0, %v50_v7  ;;  %537 = vperm.xlu0 %848, %v515_v22   ;;  %v853_v61 = vld [vmem:[%s1121_s1 + $0x18] sm:$0xff]   ;;  %v854_v62 = vld [vmem:[%s1121_s1 + $0x20] sm:$0xff]   ;;  %v855_v63 = vld [vmem:[%s1121_s1 + $0x28] sm:$0xff]  }
   0xe   :  { %547 = vperm.xlu1 %849, %v517_v23   ;;  %v856_v0 = vld [vmem:[%s1121_s1 + $0x30] sm:$0xff]   ;;  %v857_v1 = vld [vmem:[%s1121_s1 + $0x38] sm:$0xff]  }
  0x10   :  { %784 = vmatmul.mubr.msk.f32.gmra.mxu0 %vm61_vm0, %v51_v8 }
  0x11   :  { %786 = vmatprep.mubr.msk.f32.mxu0 %vm61_vm0, %v52_v9  ;;  %552 = vperm.xlu0 %848, %v518_v24  }
  0x12   :  { %557 = vperm.xlu1 %849, %v519_v25  }
  0x14   :  { %787 = vmatmul.mubr.msk.f32.gmra.mxu0 %vm61_vm0, %v53_v10 }
  0x15   :  { %789 = vmatprep.mubr.msk.f32.mxu0 %vm61_vm0, %v54_v11  ;;  %562 = vperm.xlu0 %848, %v520_v26   ;;  %v1041_v11 = vld [vmem:[%s1123_s3] ss:$0 sm:$0xff] }
  0x16   :  { %567 = vperm.xlu1 %849, %v521_v27  }
  0x18   :  { %790 = vmatmul.mubr.msk.f32.gmra.mxu0 %vm61_vm0, %v55_v12 }
  0x19   :  { %792 = vmatprep.mubr.msk.f32.mxu0 %vm61_vm0, %v56_v13  ;;  %572 = vperm.xlu0 %848, %v522_v28  }
  0x1a   :  { %577 = vperm.xlu1 %849, %v523_v29  }
  0x1c   :  { %793 = vmatmul.mubr.msk.f32.gmra.mxu0 %vm61_vm0, %v57_v14 }
  0x1d   :  { %795 = vmatprep.mubr.msk.f32.mxu0 %vm61_vm0, %v58_v15  ;;  %582 = vperm.xlu0 %848, %v524_v30  }
  0x1e   :  { %587 = vperm.xlu1 %849, %v525_v31  }
  0x20   :  { %796 = vmatmul.mubr.msk.f32.gmra.mxu0 %vm61_vm0, %v59_v16 }
  0x21   :  { %814 = vmatprep.mubr.bf16.mxu0 %v850_v17  ;;  %592 = vperm.xlu0 %848, %v526_v32  }
  0x22   :  { %597 = vperm.xlu1 %849, %v527_v33  }
  0x25   :  { %602 = vperm.xlu0 %848, %v528_v34  }
  0x26   :  { %607 = vperm.xlu1 %849, %v529_v35  }
  0x84   :  { %v533_v2 = vpop.permute.xlu0 %532 }
  0x85   :  { %v543_v3 = vpop.permute.xlu1 %542 }
  0x88   :  { %v538_v4 = vpop.permute.xlu0 %537 }
  0x89   :  { %v548_v5 = vpop.permute.xlu1 %547 }
  0x8c   :  { %v553_v6 = vpop.permute.xlu0 %552 }
  0x8d   :  { %v558_v7 = vpop.permute.xlu1 %557 }
  0x90   :  { %v563_v8 = vpop.permute.xlu0 %562 }
  0x91   :  { %v568_v9 = vpop.permute.xlu1 %567 }
  0x94   :  { %v573_v13 = vpop.permute.xlu0 %572 }
  0x95   :  { %v578_v24 = vpop.permute.xlu1 %577 }
  0x98   :  { %v583_v31 = vpop.permute.xlu0 %582 }
  0xc4   :  { %v776_v36 = vpop.f32.mrf.mxu0 }
  0xc6   :  { %v176_v37 = vpop.f32.mrf.mxu0 }
  0xc7   :  { %v287_v59 = vpack.c.bf16 %v776_v36, %v176_v37 }
  0xc8   :  { %v779_v38 = vpop.f32.mrf.mxu0 }
  0xca   :  { %v186_v39 = vpop.f32.mrf.mxu0 }
  0xcb   :  { %v288_v58 = vpack.c.bf16 %v779_v38, %v186_v39 }
  0xcc   :  { %v782_v40 = vpop.f32.mrf.mxu0 }
  0xce   :  { %v196_v41 = vpop.f32.mrf.mxu0 }
  0xcf   :  { %v289_v57 = vpack.c.bf16 %v782_v40, %v196_v41  ;;  %v588_v41 = vpop.permute.xlu1 %587 }
  0xd0   :  { %v785_v42 = vpop.f32.mrf.mxu0 }
  0xd2   :  { %v206_v43 = vpop.f32.mrf.mxu0 }
  0xd3   :  { %v290_v56 = vpack.c.bf16 %v785_v42, %v206_v43 }
  0xd4   :  { %v788_v44 = vpop.f32.mrf.mxu0 }
  0xd6   :  { %v216_v45 = vpop.f32.mrf.mxu0 }
  0xd7   :  { %v291_v55 = vpack.c.bf16 %v788_v44, %v216_v45 }
  0xd8   :  { %v791_v46 = vpop.f32.mrf.mxu0 }
  0xda   :  { %v226_v47 = vpop.f32.mrf.mxu0 }
  0xdb   :  { %v292_v54 = vpack.c.bf16 %v791_v46, %v226_v47 }
  0xdc   :  { %v794_v48 = vpop.f32.mrf.mxu0 }
  0xde   :  { %v236_v49 = vpop.f32.mrf.mxu0 }
  0xdf   :  { %v293_v53 = vpack.c.bf16 %v794_v48, %v236_v49  ;;  %v593_v48 = vpop.permute.xlu0 %592 }
  0xe0   :  { %v797_v50 = vpop.f32.mrf.mxu0 }
  0xe2   :  { %v246_v51 = vpop.f32.mrf.mxu0 }
  0xe3   :  { %v294_v52 = vpack.c.bf16 %v797_v50, %v246_v51 }
  0xe5   :  { %798 = vmatprep.subr.bf16.mxu0 %v294_v52  ;;  %830 = vmatprep.subr.bf16.mxu1 %v294_v52 }
  0xe6   :  { %799 = vmatpush3.bf16.msra.mxu0 %v294_v52  ;;  %838 = vmatpush3.bf16.msra.mxu1 %v294_v52 }
  0xe7   :  { %800 = vmatprep.subr.bf16.mxu0 %v293_v53  ;;  %831 = vmatprep.subr.bf16.mxu1 %v293_v53 }
  0xea   :  { %801 = vmatpush3.bf16.msra.mxu0 %v293_v53  ;;  %839 = vmatpush3.bf16.msra.mxu1 %v293_v53 }
  0xeb   :  { %802 = vmatprep.subr.bf16.mxu0 %v292_v54  ;;  %832 = vmatprep.subr.bf16.mxu1 %v292_v54 }
  0xee   :  { %803 = vmatpush3.bf16.msra.mxu0 %v292_v54  ;;  %840 = vmatpush3.bf16.msra.mxu1 %v292_v54 }
  0xef   :  { %804 = vmatprep.subr.bf16.mxu0 %v291_v55  ;;  %833 = vmatprep.subr.bf16.mxu1 %v291_v55 }
  0xf2   :  { %805 = vmatpush3.bf16.msra.mxu0 %v291_v55  ;;  %841 = vmatpush3.bf16.msra.mxu1 %v291_v55 }
  0xf3   :  { %806 = vmatprep.subr.bf16.mxu0 %v290_v56  ;;  %834 = vmatprep.subr.bf16.mxu1 %v290_v56 }
  0xf6   :  { %807 = vmatpush3.bf16.msra.mxu0 %v290_v56  ;;  %842 = vmatpush3.bf16.msra.mxu1 %v290_v56 }
  0xf7   :  { %808 = vmatprep.subr.bf16.mxu0 %v289_v57  ;;  %835 = vmatprep.subr.bf16.mxu1 %v289_v57 }
  0xfa   :  { %809 = vmatpush3.bf16.msra.mxu0 %v289_v57  ;;  %843 = vmatpush3.bf16.msra.mxu1 %v289_v57 }
  0xfb   :  { %810 = vmatprep.subr.bf16.mxu0 %v288_v58  ;;  %836 = vmatprep.subr.bf16.mxu1 %v288_v58 }
  0xfe   :  { %811 = vmatpush3.bf16.msra.mxu0 %v288_v58  ;;  %844 = vmatpush3.bf16.msra.mxu1 %v288_v58 }
  0xff   :  { %812 = vmatprep.subr.bf16.mxu0 %v287_v59  ;;  %837 = vmatprep.subr.bf16.mxu1 %v287_v59 }
 0x102   :  { %813 = vmatpush3.bf16.msra.mxu0 %v287_v59  ;;  %845 = vmatpush3.bf16.msra.mxu1 %v287_v59 }
 0x105   :  { %815 = vmatmul.mubr.bf16.vlgmr.msra.gmra.mxu0 %v852_v60  ;;  %819 = vmatmul.mubr.bf16.vlgmr.msra.gmra.mxu1 %v853_v61  ;;  %v598_v61 = vpop.permute.xlu1 %597 }
 0x106   :  { %822 = vmatprep.mubr.bf16.mxu1 %v854_v62 }
 0x10d   :  { %823 = vmatmul.mubr.bf16.gmra.mxu1 %v855_v63 }
 0x10e   :  { %826 = vmatprep.mubr.bf16.mxu1 %v856_v0 }
 0x115   :  { %827 = vmatmul.mubr.bf16.gmra.mxu1 %v857_v1 }
 0x1c5   :  { %v816_v10 = vpop.f32.mrf.mxu0  ;;  %v820_v12 = vpop.f32.mrf.mxu1 }
 0x1c6   :  { %v500_v16 = vadd.f32 %v816_v10, %v1041_v11  ;;  %v504_v17 = vadd.f32 %v820_v12, %v1041_v11 }
 0x1c7   :  { %v377_v14 = vpop.f32.mrf.mxu0  ;;  %v393_v15 = vpop.f32.mrf.mxu1 }
 0x1c8   :  { %v612_v20 = vmul.f32 %v543_v3, %v500_v16  ;;  %v1045_v21 = vmul.f32 %v563_v8, %v504_v17  ;;  %v498_v22 = vadd.f32 %v1041_v11, %v377_v14  ;;  %v502_v23 = vadd.f32 %v1041_v11, %v393_v15 }
 0x1c9   :  { %v817_v18 = vpop.f32.mrf.mxu0  ;;  %v821_v19 = vpop.f32.mrf.mxu1 }
 0x1ca   :  { %628 = vst [vmem:[%s1124_s5 + $0x10] sm:$0xff] %v612_v20  ;;  %632 = vst [vmem:[%s1124_s5 + $0x30] sm:$0xff] %v1045_v21  ;;  %v610_v27 = vmul.f32 %v533_v2, %v498_v22  ;;  %v614_v28 = vmul.f32 %v553_v6, %v502_v23  ;;  %v501_v29 = vadd.f32 %v817_v18, %v1041_v11  ;;  %v608_v18 = vpop.permute.xlu1 %607 }
 0x1cb   :  { %v380_v25 = vpop.f32.mrf.mxu0  ;;  %v396_v26 = vpop.f32.mrf.mxu1  ;;  %v505_v30 = vadd.f32 %v821_v19, %v1041_v11  ;;  %v666_v52 = vmul.f32 %v612_v20, %v612_v20  ;;  %v670_v15 = vmul.f32 %v1045_v21, %v1045_v21 }
 0x1cc   :  { %626 = vst [vmem:[%s1124_s5] sm:$0xff] %v610_v27  ;;  %630 = vst [vmem:[%s1124_s5 + $0x20] sm:$0xff] %v614_v28  ;;  %v613_v33 = vmul.f32 %v548_v5, %v501_v29  ;;  %v499_v35 = vadd.f32 %v1041_v11, %v380_v25  ;;  %v503_v36 = vadd.f32 %v1041_v11, %v396_v26 }
 0x1cd   :  { %v824_v32 = vpop.f32.mrf.mxu1  ;;  %v617_v34 = vmul.f32 %v568_v9, %v505_v30  ;;  %v664_v45 = vmul.f32 %v610_v27, %v610_v27  ;;  %v668_v1 = vmul.f32 %v614_v28, %v614_v28 }
 0x1ce   :  { %v508_v38 = vadd.f32 %v824_v32, %v1041_v11  ;;  %629 = vst [vmem:[%s1124_s5 + $0x18] sm:$0xff] %v613_v33  ;;  %v611_v39 = vmul.f32 %v538_v4, %v499_v35  ;;  %v615_v40 = vmul.f32 %v558_v7, %v503_v36  ;;  %v667_v58 = vmul.f32 %v613_v33, %v613_v33  ;;  %v603_v4 = vpop.permute.xlu0 %602 }
 0x1cf   :  { %v409_v37 = vpop.f32.mrf.mxu1  ;;  %633 = vst [vmem:[%s1124_s5 + $0x38] sm:$0xff] %v617_v34  ;;  %v671_v22 = vmul.f32 %v617_v34, %v617_v34 }
 0x1d0   :  { %v620_v43 = vmul.f32 %v583_v31, %v508_v38  ;;  %v506_v44 = vadd.f32 %v1041_v11, %v409_v37  ;;  %627 = vst [vmem:[%s1124_s5 + $0x8] sm:$0xff] %v611_v39  ;;  %v642_v46 = vadd.f32 %v611_v39, %v610_v27  ;;  %v665_v47 = vmul.f32 %v611_v39, %v611_v39 }
 0x1d1   :  { %v825_v42 = vpop.f32.mrf.mxu1  ;;  %631 = vst [vmem:[%s1124_s5 + $0x28] sm:$0xff] %v615_v40  ;;  %v669_v9 = vmul.f32 %v615_v40, %v615_v40 }
 0x1d2   :  { %636 = vst [vmem:[%s1124_s5 + $0x50] sm:$0xff] %v620_v43  ;;  %v618_v50 = vmul.f32 %v573_v13, %v506_v44  ;;  %v509_v51 = vadd.f32 %v825_v42, %v1041_v11  ;;  %v643_v53 = vadd.f32 %v642_v46, %v612_v20  ;;  %v680_v54 = vadd.f32 %v665_v47, %v664_v45 }
 0x1d3   :  { %v412_v49 = vpop.f32.mrf.mxu1  ;;  %v674_v31 = vmul.f32 %v620_v43, %v620_v43 }
 0x1d4   :  { %634 = vst [vmem:[%s1124_s5 + $0x40] sm:$0xff] %v618_v50  ;;  %v621_v56 = vmul.f32 %v588_v41, %v509_v51  ;;  %v507_v57 = vadd.f32 %v1041_v11, %v412_v49  ;;  %v681_v59 = vadd.f32 %v680_v54, %v666_v52  ;;  %v644_v60 = vadd.f32 %v643_v53, %v613_v33 }
 0x1d5   :  { %v828_v55 = vpop.f32.mrf.mxu1  ;;  %v672_v27 = vmul.f32 %v618_v50, %v618_v50 }
 0x1d6   :  { %637 = vst [vmem:[%s1124_s5 + $0x58] sm:$0xff] %v621_v56  ;;  %v619_v63 = vmul.f32 %v578_v24, %v507_v57  ;;  %v512_v0 = vadd.f32 %v828_v55, %v1041_v11  ;;  %v645_v2 = vadd.f32 %v644_v60, %v614_v28  ;;  %v682_v3 = vadd.f32 %v681_v59, %v667_v58 }
 0x1d7   :  { %v425_v62 = vpop.f32.mrf.mxu1  ;;  %v675_v33 = vmul.f32 %v621_v56, %v621_v56 }
 0x1d8   :  { %635 = vst [vmem:[%s1124_s5 + $0x48] sm:$0xff] %v619_v63  ;;  %v624_v6 = vmul.f32 %v603_v4, %v512_v0  ;;  %v510_v7 = vadd.f32 %v1041_v11, %v425_v62  ;;  %v646_v8 = vadd.f32 %v645_v2, %v615_v40  ;;  %v683_v10 = vadd.f32 %v682_v3, %v668_v1 }
 0x1d9   :  { %v829_v5 = vpop.f32.mrf.mxu1  ;;  %v673_v30 = vmul.f32 %v619_v63, %v619_v63 }
 0x1da   :  { %640 = vst [vmem:[%s1124_s5 + $0x70] sm:$0xff] %v624_v6  ;;  %v622_v13 = vmul.f32 %v593_v48, %v510_v7  ;;  %v513_v14 = vadd.f32 %v829_v5, %v1041_v11  ;;  %v647_v16 = vadd.f32 %v646_v8, %v1045_v21  ;;  %v684_v17 = vadd.f32 %v683_v10, %v669_v9 }
 0x1db   :  { %v428_v12 = vpop.f32.mrf.mxu1  ;;  %v678_v42 = vmul.f32 %v624_v6, %v624_v6 }
 0x1dc   :  { %638 = vst [vmem:[%s1124_s5 + $0x60] sm:$0xff] %v622_v13  ;;  %v625_v19 = vmul.f32 %v608_v18, %v513_v14  ;;  %v511_v20 = vadd.f32 %v1041_v11, %v428_v12  ;;  %v685_v23 = vadd.f32 %v684_v17, %v670_v15  ;;  %v648_v24 = vadd.f32 %v647_v16, %v617_v34 }
 0x1dd   :  { %v676_v37 = vmul.f32 %v622_v13, %v622_v13 }
 0x1de   :  { %641 = vst [vmem:[%s1124_s5 + $0x78] sm:$0xff] %v625_v19  ;;  %v623_v25 = vmul.f32 %v598_v61, %v511_v20  ;;  %v649_v26 = vadd.f32 %v648_v24, %v618_v50  ;;  %v686_v21 = vadd.f32 %v685_v23, %v671_v22  ;;  %v679_v46 = vmul.f32 %v625_v19, %v625_v19 }
 0x1e0   :  { %639 = vst [vmem:[%s1124_s5 + $0x68] sm:$0xff] %v623_v25  ;;  %v687_v28 = vadd.f32 %v686_v21, %v672_v27  ;;  %v650_v29 = vadd.f32 %v649_v26, %v619_v63  ;;  %v677_v41 = vmul.f32 %v623_v25, %v623_v25 }
 0x1e2   :  { %v651_v11 = vadd.f32 %v650_v29, %v620_v43  ;;  %v688_v32 = vadd.f32 %v687_v28, %v673_v30 }
 0x1e4   :  { %v689_v34 = vadd.f32 %v688_v32, %v674_v31  ;;  %v652_v35 = vadd.f32 %v651_v11, %v621_v56 }
 0x1e6   :  { %v653_v36 = vadd.f32 %v652_v35, %v622_v13  ;;  %v690_v38 = vadd.f32 %v689_v34, %v675_v33 }
 0x1e8   :  { %v691_v39 = vadd.f32 %v690_v38, %v676_v37  ;;  %v654_v40 = vadd.f32 %v653_v36, %v623_v25 }
 0x1ea   :  { %v655_v44 = vadd.f32 %v654_v40, %v624_v6  ;;  %v692_v45 = vadd.f32 %v691_v39, %v677_v41 }
 0x1ec   :  { %v656_v47 = vadd.f32 %v655_v44, %v625_v19  ;;  %v693_v48 = vadd.f32 %v692_v45, %v678_v42 }
 0x1ee   :  { %v657_v49 = vrot.slane %v656_v47, 4  ;;  %v694_v50 = vadd.f32 %v693_v48, %v679_v46 }
 0x1f0   :  { %v658_v51 = vadd.f32 %v657_v49, %v656_v47  ;;  %v695_v43 = vrot.slane %v694_v50, 4 }
 0x1f2   :  { %v659_v52 = vrot.slane %v658_v51, 2  ;;  %v696_v53 = vadd.f32 %v695_v43, %v694_v50 }
 0x1f4   :  { %v660_v54 = vadd.f32 %v659_v52, %v658_v51  ;;  %v697_v55 = vrot.slane %v696_v53, 2 }
 0x1f6   :  { %v661_v56 = vrot.slane %v660_v54, 1  ;;  %v698_v57 = vadd.f32 %v697_v55, %v696_v53 }
 0x1f8   :  { %v662_v58 = vadd.f32 %v661_v56, %v660_v54  ;;  %v699_v59 = vrot.slane %v698_v57, 1 }
 0x1fa   :  { %663 = vst [vmem:[%s1125_s6] sm:$0x1] %v662_v58  ;;  %v700_v60 = vadd.f32 %v699_v59, %v698_v57 }
 0x1fc   :  { %701 = vst [vmem:[%s1126_s7] sm:$0x1] %v700_v60 }

</bundles_post_ra>
